<compile_context>
chip_gen: v5e
topology: v5e:2x2
jax: 0.10.0
libtpu: 0.0.40
codegen_flags: <defaults>
</compile_context>

<pallas_src>
import functools

import jax
import jax.numpy as jnp
from jax import lax
from jax.experimental import pallas as pl
from jax.experimental.pallas import tpu as pltpu

LN_EPS = 1e-5


def graphmlp_kernel(x_ref, w_ref, p_ref, o_ref, h_ref, *,
                    num_nodes, in_dim, out_dim):
    # x_ref : (T, N*Din)   f32  lane-dense activations (T = A*B)
    # w_ref : (Din, Dout)  f32  shared per-node weight
    # p_ref : (8, N*Dout)  f32  param slab: row0=gamma, row1=beta, row2=bias(tiled), rest pad
    # o_ref : (T, N*Dout)  f32  lane-dense output
    # h_ref : (T, N*Dout)  f32  VMEM scratch for pre-LayerNorm activations
    N, Din, Dout = num_nodes, in_dim, out_dim

    x = x_ref[...]                                   # (T, N*Din)
    w = w_ref[...]                                   # (Din, Dout)

    # Per-node matmul, statically unrolled (N is small here).  Each result is
    # written straight into its lane slot of the scratch, so h is already in
    # the lane-dense (T, N*Dout) layout -- no in-kernel reshape/transpose.
    # For large N this loop should become a grid axis instead of an unroll.
    for n in range(N):
        h_ref[:, n * Dout:(n + 1) * Dout] = jnp.dot(
            x[:, n * Din:(n + 1) * Din], w,
            preferred_element_type=jnp.float32)

    gamma = p_ref[0:1, :]                            # (1, N*Dout)
    beta = p_ref[1:2, :]                             # (1, N*Dout)
    bias = p_ref[2:3, :]                             # (1, N*Dout)

    h = jnp.maximum(h_ref[...] + bias, 0.0)          # bias + ReLU

    # LayerNorm over [num_nodes, out_dim] == the whole last axis in this
    # layout.  Two-pass statistics (mean, then variance of centered values).
    mean = jnp.mean(h, axis=-1, keepdims=True)       # (T, 1)
    centered = h - mean
    var = jnp.mean(centered * centered, axis=-1, keepdims=True)
    y = centered * lax.rsqrt(var + LN_EPS)
    o_ref[...] = (y * gamma + beta).astype(o_ref.dtype)


@jax.jit
def graphmlp_forward(x, w, b, gamma, beta):
    A, B, N, Din = x.shape
    Dout = w.shape[1]
    T = A * B

    # Lane-dense layout: minor dims N*Din / N*Dout are multiples of 128 at the
    # example shapes -> dense loads/stores.
    x2 = x.reshape(T, N * Din)

    # Single (8, N*Dout) parameter slab: one aligned DMA instead of three
    # 1-row transfers.  row0 = LN gamma, row1 = LN beta, row2 = bias tiled per
    # node, rows 3..7 padding.
    M = N * Dout
    slab = jnp.concatenate(
        [gamma.reshape(1, M),
         beta.reshape(1, M),
         jnp.tile(b, N).reshape(1, M),
         jnp.zeros((5, M), dtype=jnp.float32)],
        axis=0)

    kernel = functools.partial(
        graphmlp_kernel, num_nodes=N, in_dim=Din, out_dim=Dout)

    out = pl.pallas_call(
        kernel,
        out_shape=jax.ShapeDtypeStruct((T, M), x.dtype),
        scratch_shapes=[pltpu.VMEM((T, M), jnp.float32)],
    )(x2, w, slab)

    return out.reshape(A, B, N, Dout)


def graphmlp_reference(x, w, b, gamma, beta):
    # Pure-JAX reference mirroring the PyTorch forward.
    h = jnp.einsum("abcd,de->abce", x, w) + b
    h = jnp.maximum(h, 0.0)
    mean = jnp.mean(h, axis=(-2, -1), keepdims=True)
    var = jnp.mean((h - mean) ** 2, axis=(-2, -1), keepdims=True)
    y = (h - mean) * lax.rsqrt(var + LN_EPS)
    return y * gamma + beta


if __name__ == "__main__":
    # Small shapes consistent with the module's forward:
    # x: (A=2, B=4, num_nodes=16, in_dim=16), out_dim=32
    A, B, N, Din, Dout = 2, 4, 16, 16, 32

    key = jax.random.PRNGKey(0)
    kx, kw, kb, kg, kbt = jax.random.split(key, 5)

    x = jax.random.normal(kx, (A, B, N, Din), dtype=jnp.float32)

    # Parameters (randomized, incl. LN affine, to exercise every layout path;
    # the module's __init__ uses randn W, zero b, ones/zeros LN affine).
    w = jax.random.normal(kw, (Din, Dout), dtype=jnp.float32)
    b = 0.1 * jax.random.normal(kb, (Dout,), dtype=jnp.float32)
    gamma = 1.0 + 0.1 * jax.random.normal(kg, (N, Dout), dtype=jnp.float32)
    beta = 0.1 * jax.random.normal(kbt, (N, Dout), dtype=jnp.float32)

    out = jax.block_until_ready(graphmlp_forward(x, w, b, gamma, beta))

    ref = graphmlp_reference(x, w, b, gamma, beta)
    assert out.shape == (A, B, N, Dout)
    assert jnp.allclose(out, ref, atol=1e-4, rtol=1e-4), "mismatch vs reference"

    print("KERNEL_OK")
</pallas_src>

<mosaic_0001>
module attributes {stable_mosaic.version = 11 : i64} {
  func.func @graphmlp_kernel(%arg0: memref<8x256xf32, #tpu.memory_space<vmem>>, %arg1: memref<16x32xf32, #tpu.memory_space<vmem>>, %arg2: memref<8x512xf32, #tpu.memory_space<vmem>>, %arg3: memref<8x512xf32, #tpu.memory_space<vmem>>, %arg4: memref<8x512xf32, #tpu.memory_space<vmem>>) attributes {dimension_semantics = [], scalar_prefetch = 0 : i64, scratch_operands = 1 : i64, tpu.core_type = #tpu.core_type<tc>} {
    %c0 = arith.constant 0 : index
    %c0_0 = arith.constant 0 : index
    %0 = vector.load %arg0[%c0, %c0_0] : memref<8x256xf32, #tpu.memory_space<vmem>>, vector<8x256xf32>
    %c0_1 = arith.constant 0 : index
    %c0_2 = arith.constant 0 : index
    %1 = vector.load %arg1[%c0_1, %c0_2] : memref<16x32xf32, #tpu.memory_space<vmem>>, vector<16x32xf32>
    %2 = vector.extract_strided_slice %0 {offsets = [0, 0], sizes = [8, 16], strides = [1, 1]} : vector<8x256xf32> to vector<8x16xf32>
    %cst = arith.constant dense<0.000000e+00> : vector<8x32xf32>
    %3 = tpu.matmul %2, %1, %cst {dimension_numbers = #tpu.dot_dimension_numbers<[1], [0], [0], [1], [0, 0, 1, 1], [], []>} : vector<8x16xf32>, vector<16x32xf32>, vector<8x32xf32> -> vector<8x32xf32>
    %c0_3 = arith.constant 0 : index
    %c0_4 = arith.constant 0 : index
    %4 = vector.load %arg4[%c0_3, %c0_4] : memref<8x512xf32, #tpu.memory_space<vmem>>, vector<8x32xf32>
    tpu.vector_store %arg4[%c0_3, %c0_4], %3 {strides = array<i32>} : memref<8x512xf32, #tpu.memory_space<vmem>>, vector<8x32xf32>,
    %5 = vector.extract_strided_slice %0 {offsets = [0, 16], sizes = [8, 16], strides = [1, 1]} : vector<8x256xf32> to vector<8x16xf32>
    %cst_5 = arith.constant dense<0.000000e+00> : vector<8x32xf32>
    %6 = tpu.matmul %5, %1, %cst_5 {dimension_numbers = #tpu.dot_dimension_numbers<[1], [0], [0], [1], [0, 0, 1, 1], [], []>} : vector<8x16xf32>, vector<16x32xf32>, vector<8x32xf32> -> vector<8x32xf32>
    %c0_6 = arith.constant 0 : index
    %c32 = arith.constant 32 : index
    %7 = vector.load %arg4[%c0_6, %c32] : memref<8x512xf32, #tpu.memory_space<vmem>>, vector<8x32xf32>
    tpu.vector_store %arg4[%c0_6, %c32], %6 {strides = array<i32>} : memref<8x512xf32, #tpu.memory_space<vmem>>, vector<8x32xf32>,
    %8 = vector.extract_strided_slice %0 {offsets = [0, 32], sizes = [8, 16], strides = [1, 1]} : vector<8x256xf32> to vector<8x16xf32>
    %cst_7 = arith.constant dense<0.000000e+00> : vector<8x32xf32>
    %9 = tpu.matmul %8, %1, %cst_7 {dimension_numbers = #tpu.dot_dimension_numbers<[1], [0], [0], [1], [0, 0, 1, 1], [], []>} : vector<8x16xf32>, vector<16x32xf32>, vector<8x32xf32> -> vector<8x32xf32>
    %c0_8 = arith.constant 0 : index
    %c64 = arith.constant 64 : index
    %10 = vector.load %arg4[%c0_8, %c64] : memref<8x512xf32, #tpu.memory_space<vmem>>, vector<8x32xf32>
    tpu.vector_store %arg4[%c0_8, %c64], %9 {strides = array<i32>} : memref<8x512xf32, #tpu.memory_space<vmem>>, vector<8x32xf32>,
    %11 = vector.extract_strided_slice %0 {offsets = [0, 48], sizes = [8, 16], strides = [1, 1]} : vector<8x256xf32> to vector<8x16xf32>
    %cst_9 = arith.constant dense<0.000000e+00> : vector<8x32xf32>
    %12 = tpu.matmul %11, %1, %cst_9 {dimension_numbers = #tpu.dot_dimension_numbers<[1], [0], [0], [1], [0, 0, 1, 1], [], []>} : vector<8x16xf32>, vector<16x32xf32>, vector<8x32xf32> -> vector<8x32xf32>
    %c0_10 = arith.constant 0 : index
    %c96 = arith.constant 96 : index
    %13 = vector.load %arg4[%c0_10, %c96] : memref<8x512xf32, #tpu.memory_space<vmem>>, vector<8x32xf32>
    tpu.vector_store %arg4[%c0_10, %c96], %12 {strides = array<i32>} : memref<8x512xf32, #tpu.memory_space<vmem>>, vector<8x32xf32>,
    %14 = vector.extract_strided_slice %0 {offsets = [0, 64], sizes = [8, 16], strides = [1, 1]} : vector<8x256xf32> to vector<8x16xf32>
    %cst_11 = arith.constant dense<0.000000e+00> : vector<8x32xf32>
    %15 = tpu.matmul %14, %1, %cst_11 {dimension_numbers = #tpu.dot_dimension_numbers<[1], [0], [0], [1], [0, 0, 1, 1], [], []>} : vector<8x16xf32>, vector<16x32xf32>, vector<8x32xf32> -> vector<8x32xf32>
    %c0_12 = arith.constant 0 : index
    %c128 = arith.constant 128 : index
    %16 = vector.load %arg4[%c0_12, %c128] : memref<8x512xf32, #tpu.memory_space<vmem>>, vector<8x32xf32>
    tpu.vector_store %arg4[%c0_12, %c128], %15 {strides = array<i32>} : memref<8x512xf32, #tpu.memory_space<vmem>>, vector<8x32xf32>,
    %17 = vector.extract_strided_slice %0 {offsets = [0, 80], sizes = [8, 16], strides = [1, 1]} : vector<8x256xf32> to vector<8x16xf32>
    %cst_13 = arith.constant dense<0.000000e+00> : vector<8x32xf32>
    %18 = tpu.matmul %17, %1, %cst_13 {dimension_numbers = #tpu.dot_dimension_numbers<[1], [0], [0], [1], [0, 0, 1, 1], [], []>} : vector<8x16xf32>, vector<16x32xf32>, vector<8x32xf32> -> vector<8x32xf32>
    %c0_14 = arith.constant 0 : index
    %c160 = arith.constant 160 : index
    %19 = vector.load %arg4[%c0_14, %c160] : memref<8x512xf32, #tpu.memory_space<vmem>>, vector<8x32xf32>
    tpu.vector_store %arg4[%c0_14, %c160], %18 {strides = array<i32>} : memref<8x512xf32, #tpu.memory_space<vmem>>, vector<8x32xf32>,
    %20 = vector.extract_strided_slice %0 {offsets = [0, 96], sizes = [8, 16], strides = [1, 1]} : vector<8x256xf32> to vector<8x16xf32>
    %cst_15 = arith.constant dense<0.000000e+00> : vector<8x32xf32>
    %21 = tpu.matmul %20, %1, %cst_15 {dimension_numbers = #tpu.dot_dimension_numbers<[1], [0], [0], [1], [0, 0, 1, 1], [], []>} : vector<8x16xf32>, vector<16x32xf32>, vector<8x32xf32> -> vector<8x32xf32>
    %c0_16 = arith.constant 0 : index
    %c192 = arith.constant 192 : index
    %22 = vector.load %arg4[%c0_16, %c192] : memref<8x512xf32, #tpu.memory_space<vmem>>, vector<8x32xf32>
    tpu.vector_store %arg4[%c0_16, %c192], %21 {strides = array<i32>} : memref<8x512xf32, #tpu.memory_space<vmem>>, vector<8x32xf32>,
    %23 = vector.extract_strided_slice %0 {offsets = [0, 112], sizes = [8, 16], strides = [1, 1]} : vector<8x256xf32> to vector<8x16xf32>
    %cst_17 = arith.constant dense<0.000000e+00> : vector<8x32xf32>
    %24 = tpu.matmul %23, %1, %cst_17 {dimension_numbers = #tpu.dot_dimension_numbers<[1], [0], [0], [1], [0, 0, 1, 1], [], []>} : vector<8x16xf32>, vector<16x32xf32>, vector<8x32xf32> -> vector<8x32xf32>
    %c0_18 = arith.constant 0 : index
    %c224 = arith.constant 224 : index
    %25 = vector.load %arg4[%c0_18, %c224] : memref<8x512xf32, #tpu.memory_space<vmem>>, vector<8x32xf32>
    tpu.vector_store %arg4[%c0_18, %c224], %24 {strides = array<i32>} : memref<8x512xf32, #tpu.memory_space<vmem>>, vector<8x32xf32>,
    %26 = vector.extract_strided_slice %0 {offsets = [0, 128], sizes = [8, 16], strides = [1, 1]} : vector<8x256xf32> to vector<8x16xf32>
    %cst_19 = arith.constant dense<0.000000e+00> : vector<8x32xf32>
    %27 = tpu.matmul %26, %1, %cst_19 {dimension_numbers = #tpu.dot_dimension_numbers<[1], [0], [0], [1], [0, 0, 1, 1], [], []>} : vector<8x16xf32>, vector<16x32xf32>, vector<8x32xf32> -> vector<8x32xf32>
    %c0_20 = arith.constant 0 : index
    %c256 = arith.constant 256 : index
    %28 = vector.load %arg4[%c0_20, %c256] : memref<8x512xf32, #tpu.memory_space<vmem>>, vector<8x32xf32>
    tpu.vector_store %arg4[%c0_20, %c256], %27 {strides = array<i32>} : memref<8x512xf32, #tpu.memory_space<vmem>>, vector<8x32xf32>,
    %29 = vector.extract_strided_slice %0 {offsets = [0, 144], sizes = [8, 16], strides = [1, 1]} : vector<8x256xf32> to vector<8x16xf32>
    %cst_21 = arith.constant dense<0.000000e+00> : vector<8x32xf32>
    %30 = tpu.matmul %29, %1, %cst_21 {dimension_numbers = #tpu.dot_dimension_numbers<[1], [0], [0], [1], [0, 0, 1, 1], [], []>} : vector<8x16xf32>, vector<16x32xf32>, vector<8x32xf32> -> vector<8x32xf32>
    %c0_22 = arith.constant 0 : index
    %c288 = arith.constant 288 : index
    %31 = vector.load %arg4[%c0_22, %c288] : memref<8x512xf32, #tpu.memory_space<vmem>>, vector<8x32xf32>
    tpu.vector_store %arg4[%c0_22, %c288], %30 {strides = array<i32>} : memref<8x512xf32, #tpu.memory_space<vmem>>, vector<8x32xf32>,
    %32 = vector.extract_strided_slice %0 {offsets = [0, 160], sizes = [8, 16], strides = [1, 1]} : vector<8x256xf32> to vector<8x16xf32>
    %cst_23 = arith.constant dense<0.000000e+00> : vector<8x32xf32>
    %33 = tpu.matmul %32, %1, %cst_23 {dimension_numbers = #tpu.dot_dimension_numbers<[1], [0], [0], [1], [0, 0, 1, 1], [], []>} : vector<8x16xf32>, vector<16x32xf32>, vector<8x32xf32> -> vector<8x32xf32>
    %c0_24 = arith.constant 0 : index
    %c320 = arith.constant 320 : index
    %34 = vector.load %arg4[%c0_24, %c320] : memref<8x512xf32, #tpu.memory_space<vmem>>, vector<8x32xf32>
    tpu.vector_store %arg4[%c0_24, %c320], %33 {strides = array<i32>} : memref<8x512xf32, #tpu.memory_space<vmem>>, vector<8x32xf32>,
    %35 = vector.extract_strided_slice %0 {offsets = [0, 176], sizes = [8, 16], strides = [1, 1]} : vector<8x256xf32> to vector<8x16xf32>
    %cst_25 = arith.constant dense<0.000000e+00> : vector<8x32xf32>
    %36 = tpu.matmul %35, %1, %cst_25 {dimension_numbers = #tpu.dot_dimension_numbers<[1], [0], [0], [1], [0, 0, 1, 1], [], []>} : vector<8x16xf32>, vector<16x32xf32>, vector<8x32xf32> -> vector<8x32xf32>
    %c0_26 = arith.constant 0 : index
    %c352 = arith.constant 352 : index
    %37 = vector.load %arg4[%c0_26, %c352] : memref<8x512xf32, #tpu.memory_space<vmem>>, vector<8x32xf32>
    tpu.vector_store %arg4[%c0_26, %c352], %36 {strides = array<i32>} : memref<8x512xf32, #tpu.memory_space<vmem>>, vector<8x32xf32>,
    %38 = vector.extract_strided_slice %0 {offsets = [0, 192], sizes = [8, 16], strides = [1, 1]} : vector<8x256xf32> to vector<8x16xf32>
    %cst_27 = arith.constant dense<0.000000e+00> : vector<8x32xf32>
    %39 = tpu.matmul %38, %1, %cst_27 {dimension_numbers = #tpu.dot_dimension_numbers<[1], [0], [0], [1], [0, 0, 1, 1], [], []>} : vector<8x16xf32>, vector<16x32xf32>, vector<8x32xf32> -> vector<8x32xf32>
    %c0_28 = arith.constant 0 : index
    %c384 = arith.constant 384 : index
    %40 = vector.load %arg4[%c0_28, %c384] : memref<8x512xf32, #tpu.memory_space<vmem>>, vector<8x32xf32>
    tpu.vector_store %arg4[%c0_28, %c384], %39 {strides = array<i32>} : memref<8x512xf32, #tpu.memory_space<vmem>>, vector<8x32xf32>,
    %41 = vector.extract_strided_slice %0 {offsets = [0, 208], sizes = [8, 16], strides = [1, 1]} : vector<8x256xf32> to vector<8x16xf32>
    %cst_29 = arith.constant dense<0.000000e+00> : vector<8x32xf32>
    %42 = tpu.matmul %41, %1, %cst_29 {dimension_numbers = #tpu.dot_dimension_numbers<[1], [0], [0], [1], [0, 0, 1, 1], [], []>} : vector<8x16xf32>, vector<16x32xf32>, vector<8x32xf32> -> vector<8x32xf32>
    %c0_30 = arith.constant 0 : index
    %c416 = arith.constant 416 : index
    %43 = vector.load %arg4[%c0_30, %c416] : memref<8x512xf32, #tpu.memory_space<vmem>>, vector<8x32xf32>
    tpu.vector_store %arg4[%c0_30, %c416], %42 {strides = array<i32>} : memref<8x512xf32, #tpu.memory_space<vmem>>, vector<8x32xf32>,
    %44 = vector.extract_strided_slice %0 {offsets = [0, 224], sizes = [8, 16], strides = [1, 1]} : vector<8x256xf32> to vector<8x16xf32>
    %cst_31 = arith.constant dense<0.000000e+00> : vector<8x32xf32>
    %45 = tpu.matmul %44, %1, %cst_31 {dimension_numbers = #tpu.dot_dimension_numbers<[1], [0], [0], [1], [0, 0, 1, 1], [], []>} : vector<8x16xf32>, vector<16x32xf32>, vector<8x32xf32> -> vector<8x32xf32>
    %c0_32 = arith.constant 0 : index
    %c448 = arith.constant 448 : index
    %46 = vector.load %arg4[%c0_32, %c448] : memref<8x512xf32, #tpu.memory_space<vmem>>, vector<8x32xf32>
    tpu.vector_store %arg4[%c0_32, %c448], %45 {strides = array<i32>} : memref<8x512xf32, #tpu.memory_space<vmem>>, vector<8x32xf32>,
    %47 = vector.extract_strided_slice %0 {offsets = [0, 240], sizes = [8, 16], strides = [1, 1]} : vector<8x256xf32> to vector<8x16xf32>
    %cst_33 = arith.constant dense<0.000000e+00> : vector<8x32xf32>
    %48 = tpu.matmul %47, %1, %cst_33 {dimension_numbers = #tpu.dot_dimension_numbers<[1], [0], [0], [1], [0, 0, 1, 1], [], []>} : vector<8x16xf32>, vector<16x32xf32>, vector<8x32xf32> -> vector<8x32xf32>
    %c0_34 = arith.constant 0 : index
    %c480 = arith.constant 480 : index
    %49 = vector.load %arg4[%c0_34, %c480] : memref<8x512xf32, #tpu.memory_space<vmem>>, vector<8x32xf32>
    tpu.vector_store %arg4[%c0_34, %c480], %48 {strides = array<i32>} : memref<8x512xf32, #tpu.memory_space<vmem>>, vector<8x32xf32>,
    %c0_35 = arith.constant 0 : index
    %c0_36 = arith.constant 0 : index
    %50 = vector.load %arg2[%c0_35, %c0_36] : memref<8x512xf32, #tpu.memory_space<vmem>>, vector<1x512xf32>
    %c1 = arith.constant 1 : index
    %c0_37 = arith.constant 0 : index
    %51 = vector.load %arg2[%c1, %c0_37] : memref<8x512xf32, #tpu.memory_space<vmem>>, vector<1x512xf32>
    %c2 = arith.constant 2 : index
    %c0_38 = arith.constant 0 : index
    %52 = vector.load %arg2[%c2, %c0_38] : memref<8x512xf32, #tpu.memory_space<vmem>>, vector<1x512xf32>
    %c0_39 = arith.constant 0 : index
    %c0_40 = arith.constant 0 : index
    %53 = vector.load %arg4[%c0_39, %c0_40] : memref<8x512xf32, #tpu.memory_space<vmem>>, vector<8x512xf32>
    %54 = vector.broadcast %52 : vector<1x512xf32> to vector<8x512xf32>
    %55 = arith.addf %53, %54 : vector<8x512xf32>
    %cst_41 = arith.constant 0.000000e+00 : f32
    %56 = vector.broadcast %cst_41 : f32 to vector<8x512xf32>
    %57 = arith.maximumf %55, %56 : vector<8x512xf32>
    %cst_42 = arith.constant dense<0.000000e+00> : vector<8xf32>
    %58 = vector.multi_reduction <add>, %57, %cst_42 [1] : vector<8x512xf32> to vector<8xf32>
    %59 = vector.shape_cast %58 : vector<8xf32> to vector<8x1xf32>
    %cst_43 = arith.constant 5.120000e+02 : f32
    %60 = vector.broadcast %cst_43 : f32 to vector<8x1xf32>
    %61 = arith.divf %59, %60 : vector<8x1xf32>
    %62 = vector.broadcast %61 : vector<8x1xf32> to vector<8x512xf32>
    %63 = arith.subf %57, %62 : vector<8x512xf32>
    %64 = arith.mulf %63, %63 : vector<8x512xf32>
    %cst_44 = arith.constant dense<0.000000e+00> : vector<8xf32>
    %65 = vector.multi_reduction <add>, %64, %cst_44 [1] : vector<8x512xf32> to vector<8xf32>
    %66 = vector.shape_cast %65 : vector<8xf32> to vector<8x1xf32>
    %cst_45 = arith.constant 5.120000e+02 : f32
    %67 = vector.broadcast %cst_45 : f32 to vector<8x1xf32>
    %68 = arith.divf %66, %67 : vector<8x1xf32>
    %cst_46 = arith.constant 9.99999974E-6 : f32
    %69 = vector.broadcast %cst_46 : f32 to vector<8x1xf32>
    %70 = arith.addf %68, %69 : vector<8x1xf32>
    %71 = math.rsqrt %70 : vector<8x1xf32>
    %72 = vector.broadcast %71 : vector<8x1xf32> to vector<8x512xf32>
    %73 = arith.mulf %63, %72 : vector<8x512xf32>
    %74 = vector.broadcast %50 : vector<1x512xf32> to vector<8x512xf32>
    %75 = arith.mulf %73, %74 : vector<8x512xf32>
    %76 = vector.broadcast %51 : vector<1x512xf32> to vector<8x512xf32>
    %77 = arith.addf %75, %76 : vector<8x512xf32>
    %c0_47 = arith.constant 0 : index
    %c0_48 = arith.constant 0 : index
    %78 = vector.load %arg3[%c0_47, %c0_48] : memref<8x512xf32, #tpu.memory_space<vmem>>, vector<8x512xf32>
    tpu.vector_store %arg3[%c0_47, %c0_48], %77 {strides = array<i32>} : memref<8x512xf32, #tpu.memory_space<vmem>>, vector<8x512xf32>,
    return
  }
}

</mosaic_0001>

<bundles_post_ra>
// kernel: tile.8
= control target key start
LH: loop header
LB: loop body
LE: loop exit
PB: predicated region body
PF: predicated region fallthrough
CT: control target
= control target key end

     0   :  { %s28_s0 = inlined_call_operand.vmem [shape: f32[32], index: 0, kind: input, shape index: {}]   ;;  %s29_s1 = inlined_call_operand.vmem [shape: f32[16,32], index: 1, kind: output, shape index: {}]  }
   0x1   :  { %v4_v0 = vld [vmem:[%s28_s0] ss:$0 sm:$0xff] }
   0x2   :  { %5 = vst [vmem:[%s29_s1] sm:$0xff] %v4_v0 }
   0x3   :  { %8 = vst [vmem:[%s29_s1 + $0x8] sm:$0xff] %v4_v0 }

// kernel: graphmlp_forward.1
= control target key start
LH: loop header
LB: loop body
LE: loop exit
PB: predicated region body
PF: predicated region fallthrough
CT: control target
= control target key end

     0   :  { %s601_s16 = smov 96   ;;  %s602_s17 = smov 112   ;;  %vm18_vm0 = vcmask 130048   ;;  %vm42_vm1 = vcmask 261120   ;;  %vm72_vm2 = vcmask 523520   ;;  %vm102_vm3 = vcmask 785920   ;;  %s750_s0 = inlined_call_operand.vmem [shape: f32[8,256], index: 0, kind: input, shape index: {}]   ;;  %s751_s1 = inlined_call_operand.vmem [shape: f32[16,32], index: 1, kind: input, shape index: {}]   ;;  %s752_s2 = inlined_call_operand.vmem [shape: f32[8,512], index: 2, kind: input, shape index: {}]   ;;  %s753_s3 = inlined_call_operand.vmem [shape: f32[8,512], index: 3, kind: output, shape index: {}]  }
   0x1   :  { %v14_v0 = vld [vmem:[%s750_s0] sm:$0xff]  ;;  %v635_v1 = vld [vmem:[%s751_s1 + $0x8] sm:$0xff]  ;;  %s603_s20 = smov 16   ;;  %s605_s21 = smov 32   ;;  %vm132_vm4 = vcmask 1048320  }
   0x2   :  { %74 = vrot.lane.b32.xlu0 %v14_v0, %s601_s16  ;;  %44 = vrot.lane.b32.xlu1 %v14_v0, %s602_s17  ;;  %v642_v2 = vld [vmem:[%s751_s1] sm:$0xff]  ;;  %s604_s1 = smov 80   ;;  %s606_s22 = smov 48   ;;  %v15_v3 = vld [vmem:[%s750_s0 + $0x8] sm:$0xff] }
   0x3   :  { %217 = vrot.lane.b32.xlu2 %v14_v0, %s603_s20  ;;  %92 = vmatpush.msra.mxu2 %v635_v1  ;;  %s607_s25 = smov 64   ;;  %v588_v44 = vld [vmem:[%s752_s2 + $0x2] ss:$8 sm:$0xf] }
   0x4   :  { %62 = vmatpush.msra.mxu1 %v635_v1  ;;  %122 = vmatpush.msra.mxu3 %v635_v1  ;;  %v480_v45 = vperm.slane %v588_v44, 1  ;;  %v479_v49 = vperm.slane %v588_v44, 0  ;;  %v481_v50 = vperm.slane %v588_v44, 2  ;;  %v482_v56 = vperm.slane %v588_v44, 3 }
   0x5   :  { %93 = vmatpush.msra.mxu2 %v642_v2  ;;  %36 = vmatpush.msra.mxu0 %v635_v1 }
   0x6   :  { %63 = vmatpush.msra.mxu1 %v642_v2  ;;  %123 = vmatpush.msra.mxu3 %v642_v2 }
   0x7   :  { %206 = vmatpush.msrb.mxu2 %v635_v1  ;;  %37 = vmatpush.msra.mxu0 %v642_v2 }
   0x8   :  { %235 = vmatpush.msrb.mxu3 %v635_v1  ;;  %177 = vmatpush.msrb.mxu1 %v635_v1 }
   0x9   :  { %207 = vmatpush.msrb.mxu2 %v642_v2  ;;  %152 = vmatpush.msrb.mxu0 %v635_v1 }
   0xa   :  { %236 = vmatpush.msrb.mxu3 %v642_v2  ;;  %104 = vrot.lane.b32.xlu0 %v14_v0, %s604_s1 }
   0xb   :  { %188 = vrot.lane.b32.xlu1 %v14_v0, %s605_s21  ;;  %159 = vrot.lane.b32.xlu2 %v14_v0, %s606_s22 }
   0xc   :  { %178 = vmatpush.msrb.mxu1 %v642_v2  ;;  %153 = vmatpush.msrb.mxu0 %v642_v2 }
   0xd   :  { %571 = vmatmul.msk.f32.vlgmr.msra.gmra.mxu0 %vm18_vm0, %v14_v0 }
   0xe   :  { %263 = vmatpush.msra.mxu0 %v635_v1 }
  0x10   :  { %264 = vmatpush.msra.mxu0 %v642_v2 }
  0x12   :  { %299 = vrot.lane.b32.xlu0 %v15_v3, %s601_s16 }
  0x13   :  { %328 = vrot.lane.b32.xlu1 %v15_v3, %s604_s1  ;;  %270 = vrot.lane.b32.xlu2 %v15_v3, %s602_s17 }
  0x1a   :  { %411 = vrot.lane.b32.xlu0 %v15_v3, %s605_s21 }
  0x1b   :  { %440 = vrot.lane.b32.xlu1 %v15_v3, %s603_s20  ;;  %382 = vrot.lane.b32.xlu2 %v15_v3, %s606_s22 }
  0x22   :  { %134 = vrot.lane.b32.xlu0 %v14_v0, %s607_s25 }
  0x23   :  { %357 = vrot.lane.b32.xlu1 %v15_v3, %s607_s25 }
  0x5d   :  { %v218_v4 = vpop.permute.xlu2 %217 }
  0x65   :  { %v160_v7 = vpop.permute.xlu2 %159 }
  0x6d   :  { %v271_v10 = vpop.permute.xlu2 %270 }
  0x74   :  { %v75_v5 = vpop.permute.xlu0 %74  ;;  %v45_v6 = vpop.permute.xlu1 %44 }
  0x75   :  { %573 = vmatmul.msk.f32.vlgmr.msra.gmra.mxu2 %vm18_vm0, %v75_v5  ;;  %572 = vmatmul.msk.f32.vlgmr.msra.gmra.mxu1 %vm18_vm0, %v45_v6  ;;  %v383_v13 = vpop.permute.xlu2 %382 }
  0x76   :  { %317 = vmatpush.msra.mxu2 %v635_v1  ;;  %288 = vmatpush.msra.mxu1 %v635_v1 }
  0x78   :  { %318 = vmatpush.msra.mxu2 %v642_v2  ;;  %289 = vmatpush.msra.mxu1 %v642_v2 }
  0x7c   :  { %v105_v8 = vpop.permute.xlu0 %104 }
  0x7d   :  { %v189_v9 = vpop.permute.xlu1 %188  ;;  %574 = vmatmul.msk.f32.vlgmr.msra.gmra.mxu3 %vm18_vm0, %v105_v8  ;;  %576 = vmatmul.msk.f32.vlgmr.msrb.gmra.mxu1 %vm18_vm0, %v160_v7 }
  0x7e   :  { %577 = vmatmul.msk.f32.vlgmr.msrb.gmra.mxu2 %vm18_vm0, %v189_v9  ;;  %346 = vmatpush.msra.mxu3 %v635_v1 }
  0x7f   :  { %429 = vmatpush.msrb.mxu2 %v635_v1  ;;  %400 = vmatpush.msrb.mxu1 %v635_v1 }
  0x80   :  { %347 = vmatpush.msra.mxu3 %v642_v2 }
  0x81   :  { %430 = vmatpush.msrb.mxu2 %v642_v2  ;;  %401 = vmatpush.msrb.mxu1 %v642_v2 }
  0x84   :  { %v300_v11 = vpop.permute.xlu0 %299 }
  0x85   :  { %578 = vmatmul.msk.f32.vlgmr.msrb.gmra.mxu3 %vm18_vm0, %v218_v4  ;;  %580 = vmatmul.msk.f32.vlgmr.msra.gmra.mxu1 %vm18_vm0, %v271_v10  ;;  %v329_v12 = vpop.permute.xlu1 %328 }
  0x86   :  { %581 = vmatmul.msk.f32.vlgmr.msra.gmra.mxu2 %vm18_vm0, %v300_v11  ;;  %458 = vmatpush.msrb.mxu3 %v635_v1 }
  0x88   :  { %459 = vmatpush.msrb.mxu3 %v642_v2 }
  0x8a   :  { %v39_v20 = vpop.f32.mrf.mxu0 }
  0x8b   :  { %43 = vst.msk [vmem:[#allocation2] sm:$0xff] %vm42_vm1, %v39_v20 }
  0x8c   :  { %v412_v14 = vpop.permute.xlu0 %411 }
  0x8d   :  { %582 = vmatmul.msk.f32.vlgmr.msra.gmra.mxu3 %vm18_vm0, %v329_v12  ;;  %584 = vmatmul.msk.f32.vlgmr.msrb.gmra.mxu1 %vm18_vm0, %v383_v13  ;;  %v441_v15 = vpop.permute.xlu1 %440 }
  0x8e   :  { %585 = vmatmul.msk.f32.vlgmr.msrb.gmra.mxu2 %vm18_vm0, %v412_v14 }
  0x94   :  { %v135_v16 = vpop.permute.xlu0 %134 }
  0x95   :  { %586 = vmatmul.msk.f32.vlgmr.msrb.gmra.mxu3 %vm18_vm0, %v441_v15  ;;  %575 = vmatmul.msk.f32.vlgmr.msrb.gmra.mxu0 %vm18_vm0, %v135_v16  ;;  %v358_v17 = vpop.permute.xlu1 %357 }
  0x96   :  { %375 = vmatpush.msrb.mxu0 %v635_v1 }
  0x98   :  { %376 = vmatpush.msrb.mxu0 %v642_v2  ;;  %v608_v2 = vmov 512.0  }
  0x99   :  { %597 = vrcp.f32 %v608_v2 }
  0x9d   :  { %579 = vmatmul.msk.f32.vlgmr.msra.gmra.mxu0 %vm18_vm0, %v15_v3 }
  0x9f   :  { %v598_v3 = vpop.eup %597 }
  0xa0   :  { %v501_v4 = vmul.f32 512.0, %v598_v3  ;;  %vm505_vm5 = vweird.f32 %v598_v3 }
  0xa2   :  { %v502_v5 = vsub.f32 1.0, %v501_v4 }
  0xa4   :  { %v503_v6 = vmul.f32 %v598_v3, %v502_v5 }
  0xa5   :  { %583 = vmatmul.msk.f32.vlgmr.msrb.gmra.mxu0 %vm18_vm0, %v358_v17 }
  0xa6   :  { %v504_v7 = vadd.f32 %v598_v3, %v503_v6 }
  0xa8   :  { %v506_v8 = vsel %vm505_vm5, %v598_v3, %v504_v7 }
  0xf2   :  { %v65_v18 = vpop.f32.mrf.mxu1 }
  0xf3   :  { %69 = vrot.lane.b32.xlu2 %v65_v18, %s605_s21 }
  0xf8   :  { %v95_v19 = vpop.f32.mrf.mxu2 }
  0xf9   :  { %99 = vrot.lane.b32.xlu1 %v95_v19, %s607_s25 }
  0xfa   :  { %v180_v21 = vpop.f32.mrf.mxu1 }
 0x100   :  { %v125_v22 = vpop.f32.mrf.mxu3 }
 0x101   :  { %v209_v23 = vpop.f32.mrf.mxu2  ;;  %129 = vrot.lane.b32.xlu0 %v125_v22, %s601_s16 }
 0x102   :  { %213 = vrot.lane.b32.xlu2 %v209_v23, %s607_s25  ;;  %v291_v24 = vpop.f32.mrf.mxu1 }
 0x108   :  { %v238_v25 = vpop.f32.mrf.mxu3 }
 0x109   :  { %184 = vrot.lane.b32.xlu0 %v180_v21, %s605_s21  ;;  %242 = vrot.lane.b32.xlu1 %v238_v25, %s601_s16  ;;  %v320_v26 = vpop.f32.mrf.mxu2 }
 0x10a   :  { %295 = vrot.lane.b32.xlu2 %v291_v24, %s605_s21  ;;  %v403_v27 = vpop.f32.mrf.mxu1 }
 0x110   :  { %v349_v28 = vpop.f32.mrf.mxu3 }
 0x111   :  { %324 = vrot.lane.b32.xlu0 %v320_v26, %s607_s25  ;;  %353 = vrot.lane.b32.xlu1 %v349_v28, %s601_s16  ;;  %v432_v29 = vpop.f32.mrf.mxu2 }
 0x112   :  { %407 = vrot.lane.b32.xlu2 %v403_v27, %s605_s21  ;;  %v155_v32 = vpop.f32.mrf.mxu0 }
 0x113   :  { %158 = vst.msk [vmem:[#allocation2 + $0x8] sm:$0xff] %vm42_vm1, %v155_v32 }
 0x118   :  { %v461_v30 = vpop.f32.mrf.mxu3 }
 0x119   :  { %436 = vrot.lane.b32.xlu0 %v432_v29, %s607_s25  ;;  %465 = vrot.lane.b32.xlu1 %v461_v30, %s601_s16  ;;  %v469_v29 = vld [vmem:[%s752_s2] ss:$8 sm:$0xf] }
 0x11a   :  { %v266_v34 = vpop.f32.mrf.mxu0 }
 0x11b   :  { %269 = vst.msk [vmem:[#allocation2 + $0x10] sm:$0xff] %vm42_vm1, %v266_v34  ;;  %v539_v34 = vperm.slane %v469_v29, 1 }
 0x122   :  { %v378_v36 = vpop.f32.mrf.mxu0 }
 0x123   :  { %381 = vst.msk [vmem:[#allocation2 + $0x18] sm:$0xff] %vm42_vm1, %v378_v36  ;;  %v541_v36 = vperm.slane %v469_v29, 3 }
 0x14d   :  { %v70_v31 = vpop.permute.xlu2 %69 }
 0x14e   :  { %73 = vst.msk [vmem:[#allocation2] sm:$0xff] %vm72_vm2, %v70_v31  ;;  %v587_v31 = vld [vmem:[%s752_s2 + $0x1] ss:$8 sm:$0xf] }
 0x15c   :  { %v214_v33 = vpop.permute.xlu2 %213 }
 0x164   :  { %v296_v35 = vpop.permute.xlu2 %295 }
 0x165   :  { %298 = vst.msk [vmem:[#allocation2 + $0x10] sm:$0xff] %vm72_vm2, %v296_v35  ;;  %v540_v35 = vperm.slane %v469_v29, 2 }
 0x16b   :  { %v100_v37 = vpop.permute.xlu1 %99 }
 0x16c   :  { %103 = vst.msk [vmem:[#allocation2] sm:$0xff] %vm102_vm3, %v100_v37  ;;  %v408_v38 = vpop.permute.xlu2 %407  ;;  %v551_v37 = vperm.slane %v587_v31, 0 }
 0x16d   :  { %410 = vst.msk [vmem:[#allocation2 + $0x18] sm:$0xff] %vm72_vm2, %v408_v38  ;;  %v552_v38 = vperm.slane %v587_v31, 1 }
 0x173   :  { %v130_v39 = vpop.permute.xlu0 %129 }
 0x174   :  { %133 = vst.msk [vmem:[#allocation2] sm:$0xff] %vm132_vm4, %v130_v39  ;;  %v553_v39 = vperm.slane %v587_v31, 2 }
 0x17b   :  { %v243_v40 = vpop.permute.xlu1 %242  ;;  %v185_v41 = vpop.permute.xlu0 %184  ;;  %v474_v51 = vld [vmem:[#allocation2] sm:$0xff] }
 0x17c   :  { %187 = vst.msk [vmem:[#allocation2 + $0x8] sm:$0xff] %vm72_vm2, %v185_v41  ;;  %v487_v54 = vadd.f32 %v479_v49, %v474_v51 }
 0x17d   :  { %216 = vst.msk [vmem:[#allocation2 + $0x8] sm:$0xff] %vm102_vm3, %v214_v33  ;;  %v538_v33 = vperm.slane %v469_v29, 0 }
 0x17e   :  { %245 = vst.msk [vmem:[#allocation2 + $0x8] sm:$0xff] %vm132_vm4, %v243_v40  ;;  %v491_v58 = vmax.f32 %v487_v54, 0.0 }
 0x183   :  { %v325_v42 = vpop.permute.xlu0 %324  ;;  %v354_v43 = vpop.permute.xlu1 %353 }
 0x184   :  { %327 = vst.msk [vmem:[#allocation2 + $0x10] sm:$0xff] %vm102_vm3, %v325_v42 }
 0x185   :  { %356 = vst.msk [vmem:[#allocation2 + $0x10] sm:$0xff] %vm132_vm4, %v354_v43  ;;  %v475_v46 = vld [vmem:[#allocation2 + $0x8] sm:$0xff] }
 0x186   :  { %v488_v53 = vadd.f32 %v480_v45, %v475_v46  ;;  %v554_v45 = vperm.slane %v587_v31, 3 }
 0x188   :  { %v492_v57 = vmax.f32 %v488_v53, 0.0 }
 0x18a   :  { %v495_v62 = vadd.f32 %v492_v57, %v491_v58 }
 0x18b   :  { %v437_v47 = vpop.permute.xlu0 %436  ;;  %v466_v48 = vpop.permute.xlu1 %465 }
 0x18c   :  { %439 = vst.msk [vmem:[#allocation2 + $0x18] sm:$0xff] %vm102_vm3, %v437_v47  ;;  %v476_v52 = vld [vmem:[#allocation2 + $0x10] sm:$0xff] }
 0x18d   :  { %468 = vst.msk [vmem:[#allocation2 + $0x18] sm:$0xff] %vm132_vm4, %v466_v48  ;;  %v489_v55 = vadd.f32 %v481_v50, %v476_v52 }
 0x18f   :  { %v493_v59 = vmax.f32 %v489_v55, 0.0 }
 0x191   :  { %v496_v0 = vadd.f32 %v495_v62, %v493_v59 }
 0x194   :  { %v477_v60 = vld [vmem:[#allocation2 + $0x18] sm:$0xff] }
 0x195   :  { %v490_v61 = vadd.f32 %v482_v56, %v477_v60 }
 0x197   :  { %v494_v63 = vmax.f32 %v490_v61, 0.0 }
 0x199   :  { %v497_v1 = vadd.f32 %v496_v0, %v494_v63 }
 0x19b   :  { %498 = vadd.xlane.f32.xlu2 %v497_v1 }
 0x20e   :  { %v499_v9 = vpop.xlane.xlu2 %498 }
 0x20f   :  { %v507_v10 = vmul.f32 %v506_v8, %v499_v9 }
 0x211   :  { %v508_v11 = vsub.f32 %v491_v58, %v507_v10  ;;  %v509_v12 = vsub.f32 %v492_v57, %v507_v10  ;;  %v510_v13 = vsub.f32 %v493_v59, %v507_v10  ;;  %v511_v14 = vsub.f32 %v494_v63, %v507_v10 }
 0x213   :  { %v512_v15 = vmul.f32 %v508_v11, %v508_v11  ;;  %v513_v16 = vmul.f32 %v509_v12, %v509_v12  ;;  %v514_v17 = vmul.f32 %v510_v13, %v510_v13  ;;  %v515_v19 = vmul.f32 %v511_v14, %v511_v14 }
 0x215   :  { %v516_v18 = vadd.f32 %v513_v16, %v512_v15 }
 0x217   :  { %v517_v20 = vadd.f32 %v516_v18, %v514_v17 }
 0x219   :  { %v518_v21 = vadd.f32 %v517_v20, %v515_v19 }
 0x21b   :  { %519 = vadd.xlane.f32.xlu0 %v518_v21 }
 0x28e   :  { %v520_v22 = vpop.xlane.xlu0 %519 }
 0x28f   :  { %v521_v23 = vmul.f32 %v520_v22, %v506_v8 }
 0x291   :  { %v522_v24 = vadd.f32 1e-05, %v521_v23 }
 0x293   :  { %599 = vrsqrt.f32 %v522_v24  ;;  %vm529_vm7 = vweird.f32 %v522_v24 }
 0x299   :  { %v600_v25 = vpop.eup %599 }
 0x29a   :  { %v524_v26 = vmul.f32 %v600_v25, %v522_v24  ;;  %vm530_vm6 = vweird.f32 %v600_v25 }
 0x29b   :  { %vm531_vm8 = vmor %vm529_vm7, %vm530_vm6 }
 0x29c   :  { %v525_v27 = vmul.f32 %v600_v25, %v524_v26 }
 0x29e   :  { %v526_v28 = vmul.f32 0.5, %v525_v27 }
 0x2a0   :  { %v527_v30 = vsub.f32 1.5, %v526_v28 }
 0x2a2   :  { %v528_v32 = vmul.f32 %v600_v25, %v527_v30 }
 0x2a4   :  { %v532_v40 = vsel %vm531_vm8, %v600_v25, %v528_v32 }
 0x2a5   :  { %v533_v41 = vmul.f32 %v532_v40, %v508_v11  ;;  %v534_v42 = vmul.f32 %v532_v40, %v509_v12  ;;  %v535_v43 = vmul.f32 %v532_v40, %v510_v13  ;;  %v536_v44 = vmul.f32 %v532_v40, %v511_v14 }
 0x2a7   :  { %v546_v46 = vmul.f32 %v538_v33, %v533_v41  ;;  %v547_v47 = vmul.f32 %v539_v34, %v534_v42  ;;  %v548_v48 = vmul.f32 %v540_v35, %v535_v43  ;;  %v549_v49 = vmul.f32 %v541_v36, %v536_v44 }
 0x2a9   :  { %v559_v50 = vadd.f32 %v551_v37, %v546_v46  ;;  %v560_v51 = vadd.f32 %v552_v38, %v547_v47  ;;  %v561_v52 = vadd.f32 %v553_v39, %v548_v48  ;;  %v562_v53 = vadd.f32 %v554_v45, %v549_v49 }
 0x2ab   :  { %563 = vst [vmem:[%s753_s3] sm:$0xff] %v559_v50 }
 0x2ac   :  { %564 = vst [vmem:[%s753_s3 + $0x8] sm:$0xff] %v560_v51 }
 0x2ad   :  { %565 = vst [vmem:[%s753_s3 + $0x10] sm:$0xff] %v561_v52 }
 0x2ae   :  { %566 = vst [vmem:[%s753_s3 + $0x18] sm:$0xff] %v562_v53 }

</bundles_post_ra>
